<compile_context>
chip_gen: v6e
topology: v6e:2x2x1
jax: 0.10.0
libtpu: 0.0.40
codegen_flags: <defaults>
</compile_context>

<pallas_src>
import functools

import jax
import jax.numpy as jnp
import numpy as np
from jax.experimental import pallas as pl
from jax.experimental.pallas import tpu as pltpu


def _attention_kernel(x_ref, wqkv_ref, wproj_ref, bproj_ref, o_ref, *, num_heads):
    # x_ref: (1, N, C) f32 block; wqkv_ref: (C, 3C) bf16; wproj_ref: (C, C) bf16;
    # bproj_ref: (1, C) f32.
    _, N, C = x_ref.shape
    H = num_heads
    hd = C // H

    x = x_ref[0].astype(jnp.bfloat16)          # (N, C) bf16
    wqkv = wqkv_ref[...]                       # (C, 3C) bf16 (scale folded into q cols)
    wproj = wproj_ref[...]                     # (C, C)  bf16

    # Fused QKV projection: one lane-dense MXU matmul, f32 accumulation.
    qkv = jnp.dot(x, wqkv, preferred_element_type=jnp.float32)   # (N, 3C) f32
    qkv = qkv.astype(jnp.bfloat16)

    # Split per head with static lane slices (matches torch reshape(B,N,3,H,hd)).
    def split_heads(base):
        return jnp.stack(
            [qkv[:, base + h * hd: base + (h + 1) * hd] for h in range(H)], axis=0
        )  # (H, N, hd) bf16

    q = split_heads(0)        # scale already folded into the q weight columns
    k = split_heads(C)
    v = split_heads(2 * C)

    # Per-head scaled dot-product attention (f32 accumulation on the MXU).
    s = jnp.einsum("hqd,hkd->hqk", q, k,
                   preferred_element_type=jnp.float32)           # (H, N, N) f32
    s = s - jnp.max(s, axis=-1, keepdims=True)
    p = jnp.exp(s)
    l = jnp.sum(p, axis=-1, keepdims=True)                       # (H, N, 1) f32

    # attn_drop: p = 0.0 in the module defaults -> identity (no-op here)

    # Unnormalized p @ v, then normalize the small (H,N,hd) result via EUP reciprocal.
    o = jnp.einsum("hqk,hkd->hqd", p.astype(jnp.bfloat16), v,
                   preferred_element_type=jnp.float32)           # (H, N, hd) f32
    o = o * pl.reciprocal(l, approx=True)

    # Merge heads back to (N, C) and do ONE fused output projection.
    o_merged = jnp.concatenate([o[h] for h in range(H)], axis=-1)  # (N, C) f32
    y = jnp.dot(o_merged.astype(jnp.bfloat16), wproj,
                preferred_element_type=jnp.float32) + bproj_ref[...]
    # proj_drop: p = 0.0 -> identity

    o_ref[0] = y.astype(o_ref.dtype)


def attention_pallas(x, w_qkv, w_proj, b_proj, num_heads):
    """x: (B, N, C) f32. w_qkv: (C, 3C), w_proj: (C, C), b_proj: (C,)."""
    B, N, C = x.shape
    H = num_heads
    hd = C // H
    scale = hd ** -0.5

    # Glue (runs once, outside the hot loop):
    #  * fold the softmax scale into the q columns of the fused qkv weight
    #  * cast the big weight slabs to bf16 (half the DMA/VMEM, 2x MXU rate)
    wqkv = (w_qkv.at[:, :C].multiply(scale)).astype(jnp.bfloat16)   # (C, 3C)
    wproj = w_proj.astype(jnp.bfloat16)                             # (C, C)
    bp = b_proj.reshape(1, C).astype(jnp.float32)                   # (1, C)

    kernel = functools.partial(_attention_kernel, num_heads=H)

    return pl.pallas_call(
        kernel,
        out_shape=jax.ShapeDtypeStruct((B, N, C), x.dtype),
        grid_spec=pltpu.PrefetchScalarGridSpec(
            num_scalar_prefetch=0,
            grid=(B,),
            in_specs=[
                pl.BlockSpec((1, N, C), lambda b: (b, 0, 0)),
                pl.BlockSpec((C, 3 * C), lambda b: (0, 0)),   # constant across grid
                pl.BlockSpec((C, C), lambda b: (0, 0)),       # constant across grid
                pl.BlockSpec((1, C), lambda b: (0, 0)),       # constant across grid
            ],
            out_specs=pl.BlockSpec((1, N, C), lambda b: (b, 0, 0)),
        ),
        compiler_params=pltpu.CompilerParams(
            dimension_semantics=("parallel",),
            vmem_limit_bytes=32 * 1024 * 1024,
        ),
    )(x, wqkv, wproj, bp)


def attention_reference(x, w_qkv, w_proj, b_proj, num_heads):
    """Pure-JAX f32 reference matching the PyTorch forward exactly."""
    B, N, C = x.shape
    H = num_heads
    hd = C // H
    scale = hd ** -0.5
    qkv = x @ w_qkv                                               # (B, N, 3C)
    qkv = qkv.reshape(B, N, 3, H, hd).transpose(2, 0, 3, 1, 4)    # (3, B, H, N, hd)
    q, k, v = qkv[0] * scale, qkv[1], qkv[2]
    attn = jnp.einsum("bhqd,bhkd->bhqk", q, k)
    attn = jax.nn.softmax(attn, axis=-1)
    out = jnp.einsum("bhqk,bhkd->bhqd", attn, v)                  # (B, H, N, hd)
    out = out.transpose(0, 2, 1, 3).reshape(B, N, C)
    return out @ w_proj + b_proj


if __name__ == "__main__":
    # Small shapes consistent with the module: B=2 batch, N=8 tokens,
    # C=32 channels, 8 heads -> head_dim=4. qkv_bias=False, proj_bias=True.
    B, N, C, H = 2, 8, 32, 8

    key = jax.random.PRNGKey(0)
    kx, kqkv, kproj, kb = jax.random.split(key, 4)

    x = jax.random.normal(kx, (B, N, C), dtype=jnp.float32)
    w_qkv = 0.05 * jax.random.normal(kqkv, (C, 3 * C), dtype=jnp.float32)
    w_proj = 0.05 * jax.random.normal(kproj, (C, C), dtype=jnp.float32)
    b_proj = 0.01 * jax.random.normal(kb, (C,), dtype=jnp.float32)

    out = attention_pallas(x, w_qkv, w_proj, b_proj, num_heads=H)
    out = jax.block_until_ready(out)

    ref = attention_reference(x, w_qkv, w_proj, b_proj, num_heads=H)
    # Tolerance loosened vs the f32 reference because the kernel uses bf16 MXU
    # inputs (f32 accumulation) and an EUP approximate reciprocal.
    np.testing.assert_allclose(np.asarray(out), np.asarray(ref), rtol=5e-2, atol=5e-3)

    print("KERNEL_OK")
</pallas_src>

<mosaic_0001>
module attributes {stable_mosaic.version = 11 : i64} {
  func.func @_attention_kernel(%arg0: i32, %arg1: memref<1x8x32xf32, #tpu.memory_space<vmem>>, %arg2: memref<32x96xbf16, #tpu.memory_space<vmem>>, %arg3: memref<32x32xbf16, #tpu.memory_space<vmem>>, %arg4: memref<1x32xf32, #tpu.memory_space<vmem>>, %arg5: memref<1x8x32xf32, #tpu.memory_space<vmem>>) attributes {dimension_semantics = [#tpu.dimension_semantics<parallel>], iteration_bounds = array<i64: 2>, scalar_prefetch = 0 : i64, scratch_operands = 0 : i64, tpu.core_type = #tpu.core_type<tc>, window_params = [{transform_indices = @transform_0, window_bounds = array<i64: 1, 8, 32>}, {pipeline_mode = #tpu.pipeline_mode<synchronous>, transform_indices = @transform_1, window_bounds = array<i64: 32, 96>}, {pipeline_mode = #tpu.pipeline_mode<synchronous>, transform_indices = @transform_2, window_bounds = array<i64: 32, 32>}, {pipeline_mode = #tpu.pipeline_mode<synchronous>, transform_indices = @transform_3, window_bounds = array<i64: 1, 32>}, {transform_indices = @transform_4, window_bounds = array<i64: 1, 8, 32>}]} {
    %c0 = arith.constant 0 : index
    %c0_0 = arith.constant 0 : index
    %c0_1 = arith.constant 0 : index
    %0 = vector.load %arg1[%c0, %c0_0, %c0_1] : memref<1x8x32xf32, #tpu.memory_space<vmem>>, vector<1x8x32xf32>
    %1 = vector.shape_cast %0 : vector<1x8x32xf32> to vector<8x32xf32>
    %2 = arith.truncf %1 : vector<8x32xf32> to vector<8x32xbf16>
    %c0_2 = arith.constant 0 : index
    %c0_3 = arith.constant 0 : index
    %3 = vector.load %arg2[%c0_2, %c0_3] : memref<32x96xbf16, #tpu.memory_space<vmem>>, vector<32x96xbf16>
    %c0_4 = arith.constant 0 : index
    %c0_5 = arith.constant 0 : index
    %4 = vector.load %arg3[%c0_4, %c0_5] : memref<32x32xbf16, #tpu.memory_space<vmem>>, vector<32x32xbf16>
    %cst = arith.constant dense<0.000000e+00> : vector<8x96xf32>
    %5 = tpu.matmul %2, %3, %cst {dimension_numbers = #tpu.dot_dimension_numbers<[1], [0], [0], [1], [0, 0, 1, 1], [], []>} : vector<8x32xbf16>, vector<32x96xbf16>, vector<8x96xf32> -> vector<8x96xf32>
    %6 = arith.truncf %5 : vector<8x96xf32> to vector<8x96xbf16>
    %7 = vector.extract_strided_slice %6 {offsets = [0, 0], sizes = [8, 4], strides = [1, 1]} : vector<8x96xbf16> to vector<8x4xbf16>
    %8 = vector.extract_strided_slice %6 {offsets = [0, 4], sizes = [8, 4], strides = [1, 1]} : vector<8x96xbf16> to vector<8x4xbf16>
    %9 = vector.extract_strided_slice %6 {offsets = [0, 8], sizes = [8, 4], strides = [1, 1]} : vector<8x96xbf16> to vector<8x4xbf16>
    %10 = vector.extract_strided_slice %6 {offsets = [0, 12], sizes = [8, 4], strides = [1, 1]} : vector<8x96xbf16> to vector<8x4xbf16>
    %11 = vector.extract_strided_slice %6 {offsets = [0, 16], sizes = [8, 4], strides = [1, 1]} : vector<8x96xbf16> to vector<8x4xbf16>
    %12 = vector.extract_strided_slice %6 {offsets = [0, 20], sizes = [8, 4], strides = [1, 1]} : vector<8x96xbf16> to vector<8x4xbf16>
    %13 = vector.extract_strided_slice %6 {offsets = [0, 24], sizes = [8, 4], strides = [1, 1]} : vector<8x96xbf16> to vector<8x4xbf16>
    %14 = vector.extract_strided_slice %6 {offsets = [0, 28], sizes = [8, 4], strides = [1, 1]} : vector<8x96xbf16> to vector<8x4xbf16>
    %15 = vector.shape_cast %7 : vector<8x4xbf16> to vector<1x8x4xbf16>
    %16 = vector.shape_cast %8 : vector<8x4xbf16> to vector<1x8x4xbf16>
    %17 = vector.shape_cast %9 : vector<8x4xbf16> to vector<1x8x4xbf16>
    %18 = vector.shape_cast %10 : vector<8x4xbf16> to vector<1x8x4xbf16>
    %19 = vector.shape_cast %11 : vector<8x4xbf16> to vector<1x8x4xbf16>
    %20 = vector.shape_cast %12 : vector<8x4xbf16> to vector<1x8x4xbf16>
    %21 = vector.shape_cast %13 : vector<8x4xbf16> to vector<1x8x4xbf16>
    %22 = vector.shape_cast %14 : vector<8x4xbf16> to vector<1x8x4xbf16>
    %23 = tpu.concatenate %15, %16, %17, %18, %19, %20, %21, %22 in 0 : vector<1x8x4xbf16>, vector<1x8x4xbf16>, vector<1x8x4xbf16>, vector<1x8x4xbf16>, vector<1x8x4xbf16>, vector<1x8x4xbf16>, vector<1x8x4xbf16>, vector<1x8x4xbf16> -> vector<8x8x4xbf16>
    %24 = vector.extract_strided_slice %6 {offsets = [0, 32], sizes = [8, 4], strides = [1, 1]} : vector<8x96xbf16> to vector<8x4xbf16>
    %25 = vector.extract_strided_slice %6 {offsets = [0, 36], sizes = [8, 4], strides = [1, 1]} : vector<8x96xbf16> to vector<8x4xbf16>
    %26 = vector.extract_strided_slice %6 {offsets = [0, 40], sizes = [8, 4], strides = [1, 1]} : vector<8x96xbf16> to vector<8x4xbf16>
    %27 = vector.extract_strided_slice %6 {offsets = [0, 44], sizes = [8, 4], strides = [1, 1]} : vector<8x96xbf16> to vector<8x4xbf16>
    %28 = vector.extract_strided_slice %6 {offsets = [0, 48], sizes = [8, 4], strides = [1, 1]} : vector<8x96xbf16> to vector<8x4xbf16>
    %29 = vector.extract_strided_slice %6 {offsets = [0, 52], sizes = [8, 4], strides = [1, 1]} : vector<8x96xbf16> to vector<8x4xbf16>
    %30 = vector.extract_strided_slice %6 {offsets = [0, 56], sizes = [8, 4], strides = [1, 1]} : vector<8x96xbf16> to vector<8x4xbf16>
    %31 = vector.extract_strided_slice %6 {offsets = [0, 60], sizes = [8, 4], strides = [1, 1]} : vector<8x96xbf16> to vector<8x4xbf16>
    %32 = vector.shape_cast %24 : vector<8x4xbf16> to vector<1x8x4xbf16>
    %33 = vector.shape_cast %25 : vector<8x4xbf16> to vector<1x8x4xbf16>
    %34 = vector.shape_cast %26 : vector<8x4xbf16> to vector<1x8x4xbf16>
    %35 = vector.shape_cast %27 : vector<8x4xbf16> to vector<1x8x4xbf16>
    %36 = vector.shape_cast %28 : vector<8x4xbf16> to vector<1x8x4xbf16>
    %37 = vector.shape_cast %29 : vector<8x4xbf16> to vector<1x8x4xbf16>
    %38 = vector.shape_cast %30 : vector<8x4xbf16> to vector<1x8x4xbf16>
    %39 = vector.shape_cast %31 : vector<8x4xbf16> to vector<1x8x4xbf16>
    %40 = tpu.concatenate %32, %33, %34, %35, %36, %37, %38, %39 in 0 : vector<1x8x4xbf16>, vector<1x8x4xbf16>, vector<1x8x4xbf16>, vector<1x8x4xbf16>, vector<1x8x4xbf16>, vector<1x8x4xbf16>, vector<1x8x4xbf16>, vector<1x8x4xbf16> -> vector<8x8x4xbf16>
    %41 = vector.extract_strided_slice %6 {offsets = [0, 64], sizes = [8, 4], strides = [1, 1]} : vector<8x96xbf16> to vector<8x4xbf16>
    %42 = vector.extract_strided_slice %6 {offsets = [0, 68], sizes = [8, 4], strides = [1, 1]} : vector<8x96xbf16> to vector<8x4xbf16>
    %43 = vector.extract_strided_slice %6 {offsets = [0, 72], sizes = [8, 4], strides = [1, 1]} : vector<8x96xbf16> to vector<8x4xbf16>
    %44 = vector.extract_strided_slice %6 {offsets = [0, 76], sizes = [8, 4], strides = [1, 1]} : vector<8x96xbf16> to vector<8x4xbf16>
    %45 = vector.extract_strided_slice %6 {offsets = [0, 80], sizes = [8, 4], strides = [1, 1]} : vector<8x96xbf16> to vector<8x4xbf16>
    %46 = vector.extract_strided_slice %6 {offsets = [0, 84], sizes = [8, 4], strides = [1, 1]} : vector<8x96xbf16> to vector<8x4xbf16>
    %47 = vector.extract_strided_slice %6 {offsets = [0, 88], sizes = [8, 4], strides = [1, 1]} : vector<8x96xbf16> to vector<8x4xbf16>
    %48 = vector.extract_strided_slice %6 {offsets = [0, 92], sizes = [8, 4], strides = [1, 1]} : vector<8x96xbf16> to vector<8x4xbf16>
    %49 = vector.shape_cast %41 : vector<8x4xbf16> to vector<1x8x4xbf16>
    %50 = vector.shape_cast %42 : vector<8x4xbf16> to vector<1x8x4xbf16>
    %51 = vector.shape_cast %43 : vector<8x4xbf16> to vector<1x8x4xbf16>
    %52 = vector.shape_cast %44 : vector<8x4xbf16> to vector<1x8x4xbf16>
    %53 = vector.shape_cast %45 : vector<8x4xbf16> to vector<1x8x4xbf16>
    %54 = vector.shape_cast %46 : vector<8x4xbf16> to vector<1x8x4xbf16>
    %55 = vector.shape_cast %47 : vector<8x4xbf16> to vector<1x8x4xbf16>
    %56 = vector.shape_cast %48 : vector<8x4xbf16> to vector<1x8x4xbf16>
    %57 = tpu.concatenate %49, %50, %51, %52, %53, %54, %55, %56 in 0 : vector<1x8x4xbf16>, vector<1x8x4xbf16>, vector<1x8x4xbf16>, vector<1x8x4xbf16>, vector<1x8x4xbf16>, vector<1x8x4xbf16>, vector<1x8x4xbf16>, vector<1x8x4xbf16> -> vector<8x8x4xbf16>
    "tpu.trace_start"() <{level = 10 : i32, message = "hqd,hkd->hqk"}> : () -> ()
    %cst_6 = arith.constant dense<0.000000e+00> : vector<8x8x8xf32>
    %58 = tpu.matmul %23, %40, %cst_6 {dimension_numbers = #tpu.dot_dimension_numbers<[2], [2], [1], [1], [0, 0, 0, 1, 1, 1], [0], [0]>} : vector<8x8x4xbf16>, vector<8x8x4xbf16>, vector<8x8x8xf32> -> vector<8x8x8xf32>
    "tpu.trace_stop"() : () -> ()
    %cst_7 = arith.constant dense<0xFF800000> : vector<8x8xf32>
    %59 = vector.multi_reduction <maximumf>, %58, %cst_7 [2] : vector<8x8x8xf32> to vector<8x8xf32>
    %60 = vector.shape_cast %59 : vector<8x8xf32> to vector<8x8x1xf32>
    %61 = vector.broadcast %60 : vector<8x8x1xf32> to vector<8x8x8xf32>
    %62 = arith.subf %58, %61 : vector<8x8x8xf32>
    %63 = math.exp %62 : vector<8x8x8xf32>
    %cst_8 = arith.constant dense<0.000000e+00> : vector<8x8xf32>
    %64 = vector.multi_reduction <add>, %63, %cst_8 [2] : vector<8x8x8xf32> to vector<8x8xf32>
    %65 = vector.shape_cast %64 : vector<8x8xf32> to vector<8x8x1xf32>
    %66 = arith.truncf %63 : vector<8x8x8xf32> to vector<8x8x8xbf16>
    "tpu.trace_start"() <{level = 10 : i32, message = "hqk,hkd->hqd"}> : () -> ()
    %cst_9 = arith.constant dense<0.000000e+00> : vector<8x8x4xf32>
    %67 = tpu.matmul %66, %57, %cst_9 {dimension_numbers = #tpu.dot_dimension_numbers<[2], [1], [1], [2], [0, 0, 0, 1, 1, 2], [0], [0]>} : vector<8x8x8xbf16>, vector<8x8x4xbf16>, vector<8x8x4xf32> -> vector<8x8x4xf32>
    "tpu.trace_stop"() : () -> ()
    %68 = tpu.reciprocal %65 {approx = true} : vector<8x8x1xf32> -> vector<8x8x1xf32>
    %69 = vector.broadcast %68 : vector<8x8x1xf32> to vector<8x8x4xf32>
    %70 = arith.mulf %67, %69 : vector<8x8x4xf32>
    %71 = vector.extract_strided_slice %70 {offsets = [0, 0, 0], sizes = [1, 8, 4], strides = [1, 1, 1]} : vector<8x8x4xf32> to vector<1x8x4xf32>
    %72 = vector.shape_cast %71 : vector<1x8x4xf32> to vector<8x4xf32>
    %73 = vector.extract_strided_slice %70 {offsets = [1, 0, 0], sizes = [1, 8, 4], strides = [1, 1, 1]} : vector<8x8x4xf32> to vector<1x8x4xf32>
    %74 = vector.shape_cast %73 : vector<1x8x4xf32> to vector<8x4xf32>
    %75 = vector.extract_strided_slice %70 {offsets = [2, 0, 0], sizes = [1, 8, 4], strides = [1, 1, 1]} : vector<8x8x4xf32> to vector<1x8x4xf32>
    %76 = vector.shape_cast %75 : vector<1x8x4xf32> to vector<8x4xf32>
    %77 = vector.extract_strided_slice %70 {offsets = [3, 0, 0], sizes = [1, 8, 4], strides = [1, 1, 1]} : vector<8x8x4xf32> to vector<1x8x4xf32>
    %78 = vector.shape_cast %77 : vector<1x8x4xf32> to vector<8x4xf32>
    %79 = vector.extract_strided_slice %70 {offsets = [4, 0, 0], sizes = [1, 8, 4], strides = [1, 1, 1]} : vector<8x8x4xf32> to vector<1x8x4xf32>
    %80 = vector.shape_cast %79 : vector<1x8x4xf32> to vector<8x4xf32>
    %81 = vector.extract_strided_slice %70 {offsets = [5, 0, 0], sizes = [1, 8, 4], strides = [1, 1, 1]} : vector<8x8x4xf32> to vector<1x8x4xf32>
    %82 = vector.shape_cast %81 : vector<1x8x4xf32> to vector<8x4xf32>
    %83 = vector.extract_strided_slice %70 {offsets = [6, 0, 0], sizes = [1, 8, 4], strides = [1, 1, 1]} : vector<8x8x4xf32> to vector<1x8x4xf32>
    %84 = vector.shape_cast %83 : vector<1x8x4xf32> to vector<8x4xf32>
    %85 = vector.extract_strided_slice %70 {offsets = [7, 0, 0], sizes = [1, 8, 4], strides = [1, 1, 1]} : vector<8x8x4xf32> to vector<1x8x4xf32>
    %86 = vector.shape_cast %85 : vector<1x8x4xf32> to vector<8x4xf32>
    %87 = tpu.concatenate %72, %74, %76, %78, %80, %82, %84, %86 in 1 : vector<8x4xf32>, vector<8x4xf32>, vector<8x4xf32>, vector<8x4xf32>, vector<8x4xf32>, vector<8x4xf32>, vector<8x4xf32>, vector<8x4xf32> -> vector<8x32xf32>
    %88 = arith.truncf %87 : vector<8x32xf32> to vector<8x32xbf16>
    %cst_10 = arith.constant dense<0.000000e+00> : vector<8x32xf32>
    %89 = tpu.matmul %88, %4, %cst_10 {dimension_numbers = #tpu.dot_dimension_numbers<[1], [0], [0], [1], [0, 0, 1, 1], [], []>} : vector<8x32xbf16>, vector<32x32xbf16>, vector<8x32xf32> -> vector<8x32xf32>
    %c0_11 = arith.constant 0 : index
    %c0_12 = arith.constant 0 : index
    %90 = vector.load %arg4[%c0_11, %c0_12] : memref<1x32xf32, #tpu.memory_space<vmem>>, vector<1x32xf32>
    %91 = vector.broadcast %90 : vector<1x32xf32> to vector<8x32xf32>
    %92 = arith.addf %89, %91 : vector<8x32xf32>
    %c0_13 = arith.constant 0 : index
    %c0_14 = arith.constant 0 : index
    %c0_15 = arith.constant 0 : index
    %93 = vector.load %arg5[%c0_13, %c0_14, %c0_15] : memref<1x8x32xf32, #tpu.memory_space<vmem>>, vector<1x8x32xf32>
    %94 = vector.shape_cast %93 : vector<1x8x32xf32> to vector<8x32xf32>
    %95 = vector.shape_cast %92 : vector<8x32xf32> to vector<1x8x32xf32>
    tpu.vector_store %arg5[%c0_13, %c0_14, %c0_15], %95 {strides = array<i32>} : memref<1x8x32xf32, #tpu.memory_space<vmem>>, vector<1x8x32xf32>,
    return
  }
  func.func @transform_0(%arg0: i32) -> (i32, i32, i32) {
    %c0_i32 = arith.constant 0 : i32
    %c0_i32_0 = arith.constant 0 : i32
    %c0_i32_1 = arith.constant 0 : i32
    return %arg0, %c0_i32, %c0_i32_0 : i32, i32, i32
  }
  func.func @transform_1(%arg0: i32) -> (i32, i32) {
    %c0_i32 = arith.constant 0 : i32
    %c0_i32_0 = arith.constant 0 : i32
    %c0_i32_1 = arith.constant 0 : i32
    return %c0_i32, %c0_i32_0 : i32, i32
  }
  func.func @transform_2(%arg0: i32) -> (i32, i32) {
    %c0_i32 = arith.constant 0 : i32
    %c0_i32_0 = arith.constant 0 : i32
    %c0_i32_1 = arith.constant 0 : i32
    return %c0_i32, %c0_i32_0 : i32, i32
  }
  func.func @transform_3(%arg0: i32) -> (i32, i32) {
    %c0_i32 = arith.constant 0 : i32
    %c0_i32_0 = arith.constant 0 : i32
    %c0_i32_1 = arith.constant 0 : i32
    return %c0_i32, %c0_i32_0 : i32, i32
  }
  func.func @transform_4(%arg0: i32) -> (i32, i32, i32) {
    %c0_i32 = arith.constant 0 : i32
    %c0_i32_0 = arith.constant 0 : i32
    %c0_i32_1 = arith.constant 0 : i32
    return %arg0, %c0_i32, %c0_i32_0 : i32, i32, i32
  }
}

</mosaic_0001>

<bundles_post_ra>
// kernel: tpu_custom_call.1
= control target key start
LH: loop header
LB: loop body
LE: loop exit
PB: predicated region body
PF: predicated region fallthrough
CT: control target
= control target key end

     0   :  { %9 = vsyncpa [#allocation3], 0  ;;  %s2247_s0 = inlined_call_operand.hbm [shape: f32[2,8,32], index: 0, kind: input, shape index: {}]   ;;  %s2248_s1 = inlined_call_operand.hbm [shape: bf16[32,96], index: 1, kind: input, shape index: {}]   ;;  %s2249_s2 = inlined_call_operand.hbm [shape: bf16[32,32], index: 2, kind: input, shape index: {}]   ;;  %s2250_s3 = inlined_call_operand.vmem [shape: f32[1,32], index: 3, kind: input, shape index: {}]   ;;  %s2251_s4 = inlined_call_operand.hbm [shape: f32[2,8,32], index: 4, kind: output, shape index: {}]  }
   0x1   :  { %11 = vsyncpa [#allocation3 + $0x1], 0 }
   0x2   :  { %12 = vsyncpa [#allocation6], 0 }
   0x3   :  { %13 = vsyncpa [#allocation4], 0 }
   0x4   :  { %15 = vsyncpa [#allocation4 + $0x1], 0  ;;  %s1910_s15 = smov 0   ;;  %s1912_s16 = smov 0  }
   0x5   :  { %s1914_s17 = smov 0   ;;  %s1916_s18 = smov 0  }
   0x6 LB: > { %s1931_s19 = sadd.s32 4294967295, %s1859_s18   ;;  %s1399_s20 = sadd.s32 4294967294, %s1859_s18   ;;  %s1859_s18 = sphi %s1916_s18, %s2273_s18   ;;  %s1855_s17 = sphi %s1914_s17, %s2272_s17   ;;  %s1851_s16 = sphi %s1912_s16, %s2271_s16   ;;  %s1847_s15 = sphi %s1910_s15, %s2270_s15  }
   0x7   : > { %p41_p0 = scmp.ne.s32.totalorder %s1851_s16, %s1847_s15  ;;  %p2252_p1 = scmp.eq.s32.totalorder %s1931_s19, 0 }
   0x8   : > { %p134_p3 = scmp.eq.s32.totalorder %s1399_s20, 1  ;;  %p1400_p5 = scmp.ge.s32.totalorder %s1859_s18, 1 }
   0x9   : > { %p1940_p4 = por %p2252_p1, %p41_p0  ;;  %p141_p7 = scmp.lt.s32.totalorder %s1859_s18, 3 }
   0xa   : > { %p1945_p6 = por %p134_p3, %p41_p0  ;;  %s1861_s24 = smov [#allocation5]  }
   0xb   : > { %s2256_s21 = scalar_select %p1940_p4, 1, 0 }
   0xc   : > { %s2257_s22 = scalar_select %p1945_p6, 1, 0 }
   0xd   : > { %p1950_p8 = pnand %p1400_p5, %p141_p7  ;;  %s153_s25 = sshll.u32 %s1861_s24, 4  ;;  %s154_s25 = int_to_ptr.vmem [resolvable:$true] %s153_s25 }
   0xe   : > { %s1862_s27 = smov [#allocation7]   ;;  %s1722_s29 = scalar_lea.vmem %s154_s25, 256 }
   0xf   : > { %s2258_s23 = scalar_select %p1950_p8, 1, 0 }
  0x10   : > { %p1600_p9 = pneg %p1950_p8  ;;  %s166_s28 = sshll.u32 %s1862_s27, 4  ;;  %s167_s28 = int_to_ptr.vmem [resolvable:$true] %s166_s28 }
  0x11   : > { %p1723_p13 = scmp.ne.s32.totalorder %s154_s25, %s1722_s29  ;;  %p1730_p5 = scmp.lt.s32.totalorder %s154_s25, %s154_s25 }
  0x12   : > { %p1959_p11 = pnand %p1600_p9, %p2252_p1  ;;  %p1731_p7 = scmp.lt.s32.totalorder %s1722_s29, %s1722_s29 }
  0x14   : > { %p1713_p12 = pneg %p1959_p11  ;;  %p1732_p10 = por %p1731_p7, %p1730_p5 }
  0x16   : > { %p1725_p0 = pnand %p1723_p13, %p1713_p12 }
  0x18   : > { %p1726_p3 = pneg %p1725_p0 }
  0x1a   : > { %p1733_p9 = pnand %p1732_p10, %p1726_p3 }
  0x1c   : > { %1736 = shalt.err (!%p1733_p9)
}
  0x1d   : > { %s1863_s30 = smov 64   ;;  %s1864_s5 = smov 4  }
  0x1e   : > { %1603 = dma.hbm_to_vmem [thread:$0]  (!%p1959_p11), %s2248_s1, 256, %s154_s25, [#allocation6], %s1863_s30, %s1863_s30, %s1864_s5  }
  0x1f   : > { %s1748_s8 = scalar_lea.vmem %s167_s28, 256  ;;  %p1756_p2 = scmp.lt.s32.totalorder %s167_s28, %s167_s28 }
  0x20   : > { %p1749_p1 = scmp.ne.s32.totalorder %s167_s28, %s1748_s8  ;;  %p1757_p6 = scmp.lt.s32.totalorder %s1748_s8, %s1748_s8 }
  0x22   : > { %p1751_p13 = pnand %p1749_p1, %p1713_p12  ;;  %p1758_p5 = por %p1757_p6, %p1756_p2 }
  0x24   : > { %p1752_p0 = pneg %p1751_p13 }
  0x26   : > { %p1759_p10 = pnand %p1758_p5, %p1752_p0 }
  0x28   : > { %1762 = shalt.err (!%p1759_p10)
}
  0x29   : > { %1606 = dma.hbm_to_vmem [thread:$0]  (!%p1959_p11), %s2249_s2, 256, %s167_s28, [#allocation6], %s1863_s30, %s1863_s30, %s1864_s5  }
  0x2a   : > { %s1982_s11 = sadd.s32 1, %s1859_s18   ;;  %s28_s12 = sadd.s32 1, %s1855_s17 }
  0x2b   : > { %s25_s13 = ssub.s32 %s1859_s18, %s1982_s11  ;;  %p35_p1 = scmp.ne.s32.totalorder %s1855_s17, %s1851_s16 }
  0x2c   : > { %p26_p2 = scmp.eq.s32.totalorder %s25_s13, 0  ;;  %p36_p6 = scmp.eq.s32.totalorder %s1859_s18, 0 }
  0x2d   : > { %p2260_p12 = scmp.eq.s32.totalorder %s1931_s19, 1  ;;  %p1617_p7 = scmp.lt.s32.totalorder %s1859_s18, 2 }
  0x2e   : > { %s1998_s20 = scalar_select %p26_p2, %s1855_s17, %s28_s12  }
  0x2f   : > { %p1992_p3 = por %p2260_p12, %p35_p1  ;;  %p37_p9 = por %p36_p6, %p35_p1 }
  0x30   : > { %s183_s24 = sand.u32 1, %s1855_s17   ;;  %s1405_s26 = sshll.u32 %s1859_s18, 7 }
  0x31   : > { %s2261_s14 = scalar_select %p1992_p3, 1, 0 }
  0x32   : > { %s1404_s25 = sshll.u32 %s183_s24, 3  ;;  %s2005_s29 = scalar_lea.hbm %s2247_s0, %s1405_s26 }
  0x33   : > { %s187_s30 = scalar_lea.vmem [#allocation2], %s1404_s25  ;;  %p2007_p11 = pnand %p1617_p7, %p37_p9 }
  0x34   : > { %s194_s5 = sshll.u32 %s187_s30, 4  ;;  %s184_s7 = scalar_lea.sflag [#allocation3], %s183_s24  ;;  %s195_s5 = int_to_ptr.vmem [resolvable:$true] %s194_s5 }
  0x35   : > { %s1763_s8 = scalar_lea.hbm %s2005_s29, 128  ;;  %p1765_p0 = pneg %p2007_p11 }
  0x36   : > { %p1764_p13 = scmp.ne.s32.totalorder %s2005_s29, %s1763_s8  ;;  %s1768_s12 = scalar_lea.hbm %s2247_s0, 256 }
  0x37   : > { %p1769_p1 = scmp.lt.s32.totalorder %s2005_s29, %s2247_s0  ;;  %p1770_p2 = scmp.lt.s32.totalorder %s1768_s12, %s1763_s8 }
  0x38   : > { %p1766_p5 = pnand %p1765_p0, %p1764_p13 }
  0x39   : > { %p1771_p6 = por %p1770_p2, %p1769_p1 }
  0x3a   : > { %p1767_p10 = pneg %p1766_p5 }
  0x3c   : > { %p1772_p12 = pnand %p1771_p6, %p1767_p10 }
  0x3e   : > { %1775 = shalt.err (!%p1772_p12)
}
  0x3f   : > { %s1776_s26 = scalar_lea.vmem %s195_s5, 128  ;;  %s1865_s24 = smov [#allocation2]  }
  0x40   : > { %p1777_p7 = scmp.ne.s32.totalorder %s195_s5, %s1776_s26  ;;  %s1781_s27 = sshll.u32 %s1865_s24, 4  ;;  %s1782_s27 = int_to_ptr.vmem [resolvable:$false] %s1781_s27 }
  0x41   : > { %s1783_s28 = scalar_lea.vmem %s1782_s27, 256  ;;  %p1784_p13 = scmp.lt.s32.totalorder %s195_s5, %s1782_s27 }
  0x42   : > { %p1779_p9 = pnand %p1777_p7, %p1765_p0  ;;  %p1785_p5 = scmp.lt.s32.totalorder %s1783_s28, %s1776_s26 }
  0x44   : > { %p1780_p3 = pneg %p1779_p9  ;;  %p1786_p4 = por %p1785_p5, %p1784_p13 }
  0x46   : > { %p1787_p8 = pnand %p1786_p4, %p1780_p3 }
  0x48   : > { %1790 = shalt.err (!%p1787_p8)
}
  0x49   : > { %1610 = dma.hbm_to_vmem [thread:$0]  (!%p2007_p11), %s2005_s29, 128, %s195_s5, %s184_s7  }
  0x4a   : > { %p2263_p10 = scmp.ne.s32.totalorder %s2258_s23, 0 }
  0x4b   : > { %s2028_s30 = sand.u32 (!%p2263_p10), 1, %s1851_s16   ;;  %p2264_p4 = scmp.ne.s32.totalorder (!%p2263_p10), %s2256_s21, 0 }
  0x4c   : > { %203 = sbr.rel (%p2263_p10) target bundleno = 1468 (0x5bc), region = 36  ;;  %s1407_s8 = sshll.u32 (!%p2263_p10), %s2028_s30, 3 }
  0x4d   : > { %s206_s9 = scalar_lea.sflag (!%p2263_p10), [#allocation3], %s2028_s30  ;;  %s209_s10 = scalar_lea.vmem (!%p2263_p10), [#allocation2], %s1407_s8 }
  0x51   : > { %1834 = dma.done.wait (%p2264_p4), %s206_s9, 128  }
  0x52   : > { %1836 = vsyncadd (%p2264_p4), %s206_s9, 4294967168  ;;  %p2265_p8 = scmp.eq.s32.totalorder %s1931_s19, 0 }
  0x54   : > { %1838 = dma.done.wait (%p2265_p8), [#allocation6], 512   ;;  %p2266_p3 = pmov %p2265_p8 }
  0x55   : > { %v1866_v0 = vmov 0.0   ;;  %vm1867_vm0 = vmmov 0   ;;  %v1675_v1 = vld [vmem:[#allocation5 + $0x8] sm:$0xff]   ;;  %v1676_v2 = vld [vmem:[#allocation5] sm:$0xff]   ;;  %v243_v3 = vld [vmem:[%s209_s10] sm:$0xff]  ;;  %vm265_vm1 = vcmask 261120  }
  0x56   : > { %1840 = vsyncadd (%p2266_p3), [#allocation6], 4294966784  ;;  %1476 = vmatprep.subr.bf16.mxu0 %v1866_v0  ;;  %1480 = vmatprep.mubr.msk.bf16.mxu0 %vm1867_vm0, %v1866_v0  ;;  %v244_v4 = vpack.c.bf16 %v243_v3, %v243_v3  ;;  %s1868_s21 = smov 116   ;;  %s1869_s23 = smov 124   ;;  %vm327_vm2 = vcmask 31744   ;;  %vm796_vm3 = vcmask 1043456  }
  0x57   : > { %1484 = vmatprep.subr.bf16.mxu1 %v1866_v0  ;;  %1486 = vmatprep.mubr.msk.bf16.mxu1 %vm1867_vm0, %v1866_v0  ;;  %s1870_s29 = smov 112   ;;  %s1871_s5 = smov 120   ;;  %vm710_vm4 = vcmask 64512   ;;  %vm1222_vm5 = vcmask 97280   ;;  %vm1224_vm6 = vcmask 130048   ;;  %vm1226_vm7 = vcmask 162816  }
  0x58   : > { %1477 = vmatpush3.bf16.msra.mxu0 %v1675_v1  ;;  %s1872_s6 = smov 104   ;;  %s1873_s7 = smov 108   ;;  %vm1228_vm8 = vcmask 195584   ;;  %vm1230_vm9 = vcmask 228352  }
  0x59   : > { %1478 = vmatprep.subr.bf16.mxu0 %v1866_v0  ;;  %s1874_s12 = smov 96   ;;  %s1875_s13 = smov 100  }
  0x5a   : > { %s1876_s25 = smov 64   ;;  %s1877_s26 = smov 4  }
  0x5b   : > { %s1878_s24 = smov 8   ;;  %s1879_s27 = smov 12  }
  0x5c   : > { %1479 = vmatpush3.bf16.msra.mxu0 %v1676_v2  ;;  %s1880_s28 = smov 16   ;;  %s1881_s9 = smov 20  }
  0x5d   : > { %1490 = vmatprep.subr.bf16.mxu0 %v1866_v0  ;;  %s1882_s10 = smov 28   ;;  %p2267_p0 = scmp.ne.s32.totalorder %s2261_s14, 0 }
  0x5f   : > { %1481 = vmatmul.mubr.msk.bf16.vlgmr.msra.gmra.mxu0 %vm265_vm1, %v244_v4 }
  0x60   : > { %1492 = vmatprep.mubr.msk.bf16.mxu0 %vm1867_vm0, %v1866_v0 }
 0x11f   : > { %v303_v5 = vpop.f32.mrf.mxu0 }
 0x120   : > { %v309_v6 = vpack.c.bf16 %v303_v5, %v303_v5 }
 0x121   : > { %v1482_v7 = vpop.f32.mrf.mxu0 }
 0x122   : > { %315 = vrot.lane.b32.xlu1 %v309_v6, %s1868_s21  ;;  %311 = vrot.lane.b32.xlu0 %v309_v6, %s1869_s23  ;;  %s1883_s21 = smov 24  }
 0x123   : > { %v306_v8 = vpop.f32.mrf.mxu0 }
 0x125   : > { %v1483_v9 = vpop.f32.mrf.mxu0 }
 0x126   : > { %317 = vrot.lane.b32.xlu1 %v309_v6, %s1870_s29  ;;  %313 = vrot.lane.b32.xlu0 %v309_v6, %s1871_s5  ;;  %s1435_s5 = sshll.u32 %s1931_s19, 7  ;;  %s1297_s19 = scalar_lea.sflag [#allocation4], %s2028_s30 }
 0x12a   : > { %321 = vrot.lane.b32.xlu1 %v309_v6, %s1872_s6  ;;  %319 = vrot.lane.b32.xlu0 %v309_v6, %s1873_s7  ;;  %s241_s6 = scalar_lea.vmem [#allocation8], %s1407_s8  ;;  %s1884_s8 = smov [#allocation8]  }
 0x12b   : > { %s1310_s7 = sshll.u32 %s241_s6, 4  ;;  %s2205_s7 = int_to_ptr.vmem [resolvable:$true] %s1310_s7 }
 0x12e   : > { %325 = vrot.lane.b32.xlu1 %v309_v6, %s1874_s12  ;;  %323 = vrot.lane.b32.xlu0 %v309_v6, %s1875_s13 }
 0x194   : > { %v316_v10 = vpop.permute.xlu1 %315  ;;  %v312_v11 = vpop.permute.xlu0 %311 }
 0x195   : > { %374 = vrot.lane.b32.xlu0 %v312_v11, %s1874_s12 }
 0x198   : > { %v2053_v12 = vpop.permute.xlu1 %317  ;;  %v314_v13 = vpop.permute.xlu0 %313 }
 0x199   : > { %470 = vrot.lane.b32.xlu0 %v316_v10, %s1874_s12  ;;  %422 = vrot.lane.b32.xlu1 %v314_v13, %s1874_s12 }
 0x19c   : > { %v2055_v14 = vpop.permute.xlu1 %321  ;;  %v2057_v15 = vpop.permute.xlu0 %319 }
 0x19d   : > { %518 = vrot.lane.b32.xlu1 %v2053_v12, %s1874_s12  ;;  %566 = vrot.lane.b32.xlu0 %v2057_v15, %s1874_s12 }
 0x1a0   : > { %v326_v16 = vpop.permute.xlu1 %325  ;;  %v2061_v17 = vpop.permute.xlu0 %323 }
 0x1a1   : > { %614 = vrot.lane.b32.xlu1 %v2055_v14, %s1874_s12  ;;  %662 = vrot.lane.b32.xlu0 %v2061_v17, %s1874_s12  ;;  %v332_v18 = vsel %vm327_vm2, %v326_v16, 0 }
 0x1a2   : > { %1485 = vmatpush3.bf16.xpose.msra.mxu1 %v332_v18 }
 0x1a3   : > { %1496 = vmatprep.subr.bf16.mxu1 %v1866_v0 }
 0x1a5   : > { %840 = vrot.lane.b32.xlu1 %v312_v11, %s1876_s25  ;;  %791 = vrot.lane.b32.xlu0 %v309_v6, %s1876_s25 }
 0x1a9   : > { %1487 = vmatmul.mubr.msk.bf16.vlgmr.msra.gmra.mxu1 %vm327_vm2, %v309_v6  ;;  %888 = vrot.lane.b32.xlu1 %v314_v13, %s1876_s25 }
 0x1aa   : > { %936 = vrot.lane.b32.xlu0 %v316_v10, %s1876_s25  ;;  %1498 = vmatprep.mubr.msk.bf16.mxu1 %vm1867_vm0, %v1866_v0 }
 0x207   : > { %v375_v19 = vpop.permute.xlu0 %374 }
 0x208   : > { %v380_v20 = vsel %vm327_vm2, %v375_v19, 0 }
 0x209   : > { %1491 = vmatpush3.bf16.xpose.msra.mxu0 %v380_v20 }
 0x20a   : > { %1502 = vmatprep.subr.bf16.mxu0 %v1866_v0 }
 0x20b   : > { %v423_v21 = vpop.permute.xlu1 %422  ;;  %v471_v23 = vpop.permute.xlu0 %470 }
 0x20c   : > { %v428_v22 = vsel %vm327_vm2, %v423_v21, 0  ;;  %v476_v24 = vsel %vm327_vm2, %v471_v23, 0 }
 0x20d   : > { %1497 = vmatpush3.bf16.xpose.msra.mxu1 %v428_v22 }
 0x20e   : > { %1508 = vmatprep.subr.bf16.mxu1 %v1866_v0 }
 0x20f   : > { %v519_v25 = vpop.permute.xlu1 %518  ;;  %v567_v27 = vpop.permute.xlu0 %566 }
 0x210   : > { %1493 = vmatmul.mubr.msk.bf16.vlgmr.msra.gmra.mxu0 %vm327_vm2, %v312_v11  ;;  %v524_v26 = vsel %vm327_vm2, %v519_v25, 0  ;;  %v572_v28 = vsel %vm327_vm2, %v567_v27, 0 }
 0x211   : > { %1503 = vmatpush3.bf16.xpose.msra.mxu0 %v476_v24  ;;  %1504 = vmatprep.mubr.msk.bf16.mxu0 %vm1867_vm0, %v1866_v0 }
 0x212   : > { %1514 = vmatprep.subr.bf16.mxu0 %v1866_v0 }
 0x213   : > { %v615_v29 = vpop.permute.xlu1 %614  ;;  %v663_v30 = vpop.permute.xlu0 %662 }
 0x214   : > { %1499 = vmatmul.mubr.msk.bf16.vlgmr.msra.gmra.mxu1 %vm327_vm2, %v314_v13  ;;  %v620_v31 = vsel %vm327_vm2, %v615_v29, 0  ;;  %v668_v32 = vsel %vm327_vm2, %v663_v30, 0 }
 0x215   : > { %1509 = vmatpush3.bf16.xpose.msra.mxu1 %v524_v26  ;;  %1510 = vmatprep.mubr.msk.bf16.mxu1 %vm1867_vm0, %v1866_v0 }
 0x216   : > { %1520 = vmatprep.subr.bf16.mxu1 %v1866_v0 }
 0x217   : > { %v792_v33 = vpop.permute.xlu0 %791  ;;  %v841_v35 = vpop.permute.xlu1 %840 }
 0x218   : > { %1505 = vmatmul.mubr.msk.bf16.vlgmr.msra.gmra.mxu0 %vm327_vm2, %v316_v10  ;;  %v798_v34 = vsel %vm796_vm3, %v792_v33, 0  ;;  %v846_v36 = vsel %vm796_vm3, %v841_v35, 0 }
 0x219   : > { %1515 = vmatpush3.bf16.xpose.msra.mxu0 %v572_v28  ;;  %1516 = vmatprep.mubr.msk.bf16.mxu0 %vm1867_vm0, %v1866_v0 }
 0x21a   : > { %1526 = vmatprep.subr.bf16.mxu0 %v1866_v0 }
 0x21b   : > { %v889_v13 = vpop.permute.xlu1 %888 }
 0x21c   : > { %1511 = vmatmul.mubr.msk.bf16.vlgmr.msra.gmra.mxu1 %vm327_vm2, %v2053_v12  ;;  %v894_v22 = vsel %vm796_vm3, %v889_v13, 0 }
 0x21d   : > { %1521 = vmatpush3.bf16.xpose.msra.mxu1 %v620_v31  ;;  %1522 = vmatprep.mubr.msk.bf16.mxu1 %vm1867_vm0, %v1866_v0 }
 0x21e   : > { %1532 = vmatprep.subr.bf16.mxu1 %v1866_v0 }
 0x220   : > { %1517 = vmatmul.mubr.msk.bf16.vlgmr.msra.gmra.mxu0 %vm327_vm2, %v2057_v15 }
 0x221   : > { %1527 = vmatpush3.bf16.xpose.msra.mxu0 %v668_v32  ;;  %1528 = vmatprep.mubr.msk.bf16.mxu0 %vm1867_vm0, %v1866_v0 }
 0x222   : > { %1538 = vmatprep.subr.bf16.mxu0 %v1866_v0 }
 0x224   : > { %1523 = vmatmul.mubr.msk.bf16.vlgmr.msra.gmra.mxu1 %vm327_vm2, %v2055_v14 }
 0x225   : > { %1533 = vmatpush3.bf16.msra.mxu1 %v798_v34  ;;  %1534 = vmatprep.mubr.msk.bf16.mxu1 %vm1867_vm0, %v1866_v0 }
 0x226   : > { %1544 = vmatprep.subr.bf16.mxu1 %v1866_v0 }
 0x228   : > { %1529 = vmatmul.mubr.msk.bf16.vlgmr.msra.gmra.mxu0 %vm327_vm2, %v2061_v17 }
 0x229   : > { %1539 = vmatpush3.bf16.msra.mxu0 %v846_v36  ;;  %1540 = vmatprep.mubr.msk.bf16.mxu0 %vm1867_vm0, %v1866_v0 }
 0x22a   : > { %1550 = vmatprep.subr.bf16.mxu0 %v1866_v0 }
 0x269   : > { %v368_v37 = vpop.f32.mrf.mxu1 }
 0x26a   : > { %v711_v38 = vsel %vm710_vm4, %v368_v37, -inf }
 0x26b   : > { %v1488_v39 = vpop.f32.mrf.mxu1  ;;  %712 = vmax.xlane.f32.xlu1 %v711_v38 }
 0x26d   : > { %v371_v40 = vpop.f32.mrf.mxu1 }
 0x26f   : > { %v1489_v41 = vpop.f32.mrf.mxu1 }
 0x27c   : > { %984 = vrot.lane.b32.xlu1 %v2053_v12, %s1876_s25 }
 0x2d0   : > { %v416_v42 = vpop.f32.mrf.mxu0 }
 0x2d1   : > { %v714_v43 = vsel %vm710_vm4, %v416_v42, -inf }
 0x2d2   : > { %715 = vmax.xlane.f32.xlu0 %v714_v43  ;;  %v1494_v44 = vpop.f32.mrf.mxu0 }
 0x2d4   : > { %v419_v45 = vpop.f32.mrf.mxu0  ;;  %v464_v46 = vpop.f32.mrf.mxu1 }
 0x2d5   : > { %v717_v47 = vsel %vm710_vm4, %v464_v46, -inf }
 0x2d6   : > { %v1500_v48 = vpop.f32.mrf.mxu1  ;;  %718 = vmax.xlane.f32.xlu0 %v717_v47  ;;  %v1495_v49 = vpop.f32.mrf.mxu0 }
 0x2d8   : > { %v467_v50 = vpop.f32.mrf.mxu1  ;;  %v512_v51 = vpop.f32.mrf.mxu0 }
 0x2d9   : > { %v720_v52 = vsel %vm710_vm4, %v512_v51, -inf }
 0x2da   : > { %v1501_v53 = vpop.f32.mrf.mxu1  ;;  %721 = vmax.xlane.f32.xlu1 %v720_v52  ;;  %v1506_v54 = vpop.f32.mrf.mxu0 }
 0x2dc   : > { %v515_v55 = vpop.f32.mrf.mxu0  ;;  %v560_v56 = vpop.f32.mrf.mxu1 }
 0x2dd   : > { %v723_v57 = vsel %vm710_vm4, %v560_v56, -inf }
 0x2de   : > { %v1512_v58 = vpop.f32.mrf.mxu1  ;;  %724 = vmax.xlane.f32.xlu0 %v723_v57  ;;  %v1507_v59 = vpop.f32.mrf.mxu0 }
 0x2e0   : > { %v563_v60 = vpop.f32.mrf.mxu1  ;;  %v608_v61 = vpop.f32.mrf.mxu0 }
 0x2e1   : > { %v726_v62 = vsel %vm710_vm4, %v608_v61, -inf }
 0x2e2   : > { %v1513_v63 = vpop.f32.mrf.mxu1  ;;  %727 = vmax.xlane.f32.xlu1 %v726_v62  ;;  %v1518_v1 = vpop.f32.mrf.mxu0 }
 0x2e4   : > { %v611_v2 = vpop.f32.mrf.mxu0  ;;  %v2125_v3 = vpop.f32.mrf.mxu1 }
 0x2e6   : > { %v1519_v4 = vpop.f32.mrf.mxu0  ;;  %v1524_v5 = vpop.f32.mrf.mxu1 }
 0x2e8   : > { %v659_v6 = vpop.f32.mrf.mxu1  ;;  %v2127_v7 = vpop.f32.mrf.mxu0 }
 0x2e9   : > { %v732_v8 = vsel %vm710_vm4, %v2127_v7, -inf }
 0x2ea   : > { %v1525_v9 = vpop.f32.mrf.mxu1  ;;  %733 = vmax.xlane.f32.xlu1 %v732_v8  ;;  %v1530_v10 = vpop.f32.mrf.mxu0 }
 0x2ec   : > { %v707_v11 = vpop.f32.mrf.mxu0 }
 0x2ee   : > { %v1531_v12 = vpop.f32.mrf.mxu0 }
 0x2f4   : > { %v713_v16 = vpop.xlane.xlu1 %712  ;;  %1032 = vrot.lane.b32.xlu0 %v2057_v15, %s1876_s25  ;;  %v729_v15 = vsel %vm710_vm4, %v2125_v3, -inf }
 0x2f5   : > { %v735_v18 = vsub.f32 %v368_v37, %v713_v16 }
 0x2f7   : > { %v743_v19 = vmul.f32 1.442695, %v735_v18 }
 0x2f8   : > { %v985_v26 = vpop.permute.xlu1 %984 }
 0x2f9   : > { %1679 = vpow2.f32 %v743_v19 }
 0x2fb   : > { %1080 = vrot.lane.b32.xlu1 %v2055_v14, %s1876_s25  ;;  %v937_v14 = vpop.permute.xlu0 %936 }
 0x2fc   : > { %v942_v41 = vsel %vm796_vm3, %v937_v14, 0 }
 0x306   : > { %v2135_v20 = vpop.eup %1679 }
 0x307   : > { %v783_v21 = vpack.c.bf16 %v2135_v20, %v2135_v20 }
 0x309   : > { %1535 = vmatmul.mubr.msk.bf16.vlgmr.msra.gmra.mxu1 %vm710_vm4, %v783_v21 }
 0x30a   : > { %1545 = vmatpush3.bf16.msra.mxu1 %v894_v22  ;;  %1546 = vmatprep.mubr.msk.bf16.mxu1 %vm1867_vm0, %v1866_v0 }
 0x30b   : > { %1556 = vmatprep.subr.bf16.mxu1 %v1866_v0 }
 0x313   : > { %730 = vmax.xlane.f32.xlu0 %v729_v15 }
 0x329   : > { %1128 = vrot.lane.b32.xlu0 %v2061_v17, %s1876_s25  ;;  %s2203_s25 = scalar_lea.hbm %s2251_s4, %s1435_s5 }
 0x35b   : > { %v716_v23 = vpop.xlane.xlu0 %715 }
 0x35c   : > { %v736_v24 = vsub.f32 %v416_v42, %v716_v23 }
 0x35e   : > { %v745_v25 = vmul.f32 1.442695, %v736_v24 }
 0x35f   : > { %v719_v27 = vpop.xlane.xlu0 %718 }
 0x360   : > { %1681 = vpow2.f32 %v745_v25  ;;  %v737_v28 = vsub.f32 %v464_v46, %v719_v27  ;;  %v990_v46 = vsel %vm796_vm3, %v985_v26, 0 }
 0x362   : > { %v747_v29 = vmul.f32 1.442695, %v737_v28 }
 0x363   : > { %v722_v30 = vpop.xlane.xlu1 %721 }
 0x364   : > { %1683 = vpow2.f32 %v747_v29  ;;  %v738_v31 = vsub.f32 %v512_v51, %v722_v30 }
 0x366   : > { %v749_v32 = vmul.f32 1.442695, %v738_v31 }
 0x367   : > { %v725_v33 = vpop.xlane.xlu0 %724 }
 0x368   : > { %1685 = vpow2.f32 %v749_v32  ;;  %v739_v34 = vsub.f32 %v560_v56, %v725_v33 }
 0x36a   : > { %v751_v35 = vmul.f32 1.442695, %v739_v34 }
 0x36b   : > { %v728_v36 = vpop.xlane.xlu1 %727  ;;  %v1033_v49 = vpop.permute.xlu0 %1032 }
 0x36c   : > { %1687 = vpow2.f32 %v751_v35  ;;  %v740_v17 = vsub.f32 %v608_v61, %v728_v36  ;;  %v1038_v53 = vsel %vm796_vm3, %v1033_v49, 0 }
 0x36d   : > { %v1682_v37 = vpop.eup %1681 }
 0x36e   : > { %v753_v38 = vmul.f32 1.442695, %v740_v17  ;;  %v762_v39 = vsel %vm710_vm4, %v1682_v37, 0.0  ;;  %v784_v40 = vpack.c.bf16 %v1682_v37, %v1682_v37 }
 0x36f   : > { %763 = vadd.xlane.f32.xlu1 %v762_v39 }
 0x370   : > { %1689 = vpow2.f32 %v753_v38  ;;  %1541 = vmatmul.mubr.msk.bf16.vlgmr.msra.gmra.mxu0 %vm710_vm4, %v784_v40 }
 0x371   : > { %v1684_v42 = vpop.eup %1683  ;;  %1551 = vmatpush3.bf16.msra.mxu0 %v942_v41  ;;  %1552 = vmatprep.mubr.msk.bf16.mxu0 %vm1867_vm0, %v1866_v0 }
 0x372   : > { %v765_v43 = vsel %vm710_vm4, %v1684_v42, 0.0  ;;  %v785_v44 = vpack.c.bf16 %v1684_v42, %v1684_v42  ;;  %1562 = vmatprep.subr.bf16.mxu0 %v1866_v0 }
 0x373   : > { %766 = vadd.xlane.f32.xlu0 %v765_v43  ;;  %v734_v45 = vpop.xlane.xlu1 %733 }
 0x374   : > { %v742_v47 = vsub.f32 %v2127_v7, %v734_v45  ;;  %1547 = vmatmul.mubr.msk.bf16.vlgmr.msra.gmra.mxu1 %vm710_vm4, %v785_v44 }
 0x375   : > { %v1686_v48 = vpop.eup %1685  ;;  %1557 = vmatpush3.bf16.msra.mxu1 %v990_v46  ;;  %1558 = vmatprep.mubr.msk.bf16.mxu1 %vm1867_vm0, %v1866_v0 }
 0x376   : > { %v757_v50 = vmul.f32 1.442695, %v742_v47  ;;  %v768_v51 = vsel %vm710_vm4, %v1686_v48, 0.0  ;;  %v786_v52 = vpack.c.bf16 %v1686_v48, %v1686_v48  ;;  %1568 = vmatprep.subr.bf16.mxu1 %v1866_v0 }
 0x377   : > { %769 = vadd.xlane.f32.xlu0 %v768_v51  ;;  %v1081_v55 = vpop.permute.xlu1 %1080  ;;  %v1677_v51 = vld [vmem:[#allocation7 + $0x8] sm:$0xff]  }
 0x378   : > { %1691 = vpow2.f32 %v757_v50  ;;  %1553 = vmatmul.mubr.msk.bf16.vlgmr.msra.gmra.mxu0 %vm710_vm4, %v786_v52  ;;  %v1086_v58 = vsel %vm796_vm3, %v1081_v55, 0 }
 0x379   : > { %v1688_v54 = vpop.eup %1687  ;;  %1563 = vmatpush3.bf16.msra.mxu0 %v1038_v53  ;;  %1564 = vmatprep.mubr.msk.bf16.mxu0 %vm1867_vm0, %v1866_v0 }
 0x37a   : > { %v771_v56 = vsel %vm710_vm4, %v1688_v54, 0.0  ;;  %v787_v57 = vpack.c.bf16 %v1688_v54, %v1688_v54  ;;  %1574 = vmatprep.subr.bf16.mxu0 %v1866_v0 }
 0x37b   : > { %772 = vadd.xlane.f32.xlu1 %v771_v56 }
 0x37c   : > { %1559 = vmatmul.mubr.msk.bf16.vlgmr.msra.gmra.mxu1 %vm710_vm4, %v787_v57  ;;  %v1678_v57 = vld [vmem:[#allocation7] sm:$0xff]  }
 0x37d   : > { %v1690_v59 = vpop.eup %1689  ;;  %1569 = vmatpush3.bf16.msra.mxu1 %v1086_v58  ;;  %1570 = vmatprep.mubr.msk.bf16.mxu1 %vm1867_vm0, %v1866_v0 }
 0x37e   : > { %v774_v60 = vsel %vm710_vm4, %v1690_v59, 0.0  ;;  %v788_v61 = vpack.c.bf16 %v1690_v59, %v1690_v59  ;;  %1580 = vmatprep.subr.bf16.mxu1 %v1866_v0 }
 0x37f   : > { %775 = vadd.xlane.f32.xlu0 %v774_v60 }
 0x380   : > { %1565 = vmatmul.mubr.msk.bf16.vlgmr.msra.gmra.mxu0 %vm710_vm4, %v788_v61 }
 0x381   : > { %1576 = vmatprep.mubr.msk.bf16.mxu0 %vm1867_vm0, %v1866_v0 }
 0x385   : > { %v1692_v62 = vpop.eup %1691 }
 0x386   : > { %v780_v63 = vsel %vm710_vm4, %v1692_v62, 0.0  ;;  %v790_v7 = vpack.c.bf16 %v1692_v62, %v1692_v62 }
 0x387   : > { %781 = vadd.xlane.f32.xlu0 %v780_v63 }
 0x39c   : > { %v731_v1 = vpop.xlane.xlu0 %730 }
 0x39d   : > { %v741_v2 = vsub.f32 %v2125_v3, %v731_v1  ;;  %v759_v3 = vsel %vm710_vm4, %v2135_v20, 0.0 }
 0x39f   : > { %v755_v4 = vmul.f32 1.442695, %v741_v2 }
 0x3a0   : > { %v1129_v5 = vpop.permute.xlu0 %1128 }
 0x3a1   : > { %1693 = vpow2.f32 %v755_v4  ;;  %v1134_v6 = vsel %vm796_vm3, %v1129_v5, 0 }
 0x3a2   : > { %1575 = vmatpush3.bf16.msra.mxu0 %v1134_v6 }
 0x3a5   : > { %1577 = vmatmul.mubr.msk.bf16.vlgmr.msra.gmra.mxu0 %vm710_vm4, %v790_v7 }
 0x3ae   : > { %v1694_v8 = vpop.eup %1693 }
 0x3af   : > { %v777_v9 = vsel %vm710_vm4, %v1694_v8, 0.0  ;;  %v789_v10 = vpack.c.bf16 %v1694_v8, %v1694_v8 }
 0x3b0   : > { %778 = vadd.xlane.f32.xlu1 %v777_v9 }
 0x3b1   : > { %1571 = vmatmul.mubr.msk.bf16.vlgmr.msra.gmra.mxu1 %vm710_vm4, %v789_v10 }
 0x3b2   : > { %1584 = vmatprep.mubr.msk.bf16.mxu1 %vm1867_vm0, %v1866_v0  ;;  %1581 = vmatpush3.bf16.msra.mxu1 %v1677_v51 }
 0x3b3   : > { %1582 = vmatprep.subr.bf16.mxu1 %v1866_v0 }
 0x3b4   : > { %760 = vadd.xlane.f32.xlu1 %v759_v3 }
 0x3b6   : > { %1583 = vmatpush3.bf16.msra.mxu1 %v1678_v57 }
 0x3c9   : > { %v2187_v11 = vpop.f32.mrf.mxu1 }
 0x3cb   : > { %v1536_v12 = vpop.f32.mrf.mxu1 }
 0x3cd   : > { %v837_v13 = vpop.f32.mrf.mxu1 }
 0x3cf   : > { %v1537_v16 = vpop.f32.mrf.mxu1 }
 0x3f8   : > { %v764_v18 = vpop.xlane.xlu1 %763 }
 0x3f9   : > { %1695 = vrcp.f32 %v764_v18 }
 0x3fc   : > { %v767_v19 = vpop.xlane.xlu0 %766 }
 0x3fd   : > { %1697 = vrcp.f32 %v767_v19 }
 0x400   : > { %v770_v21 = vpop.xlane.xlu0 %769 }
 0x401   : > { %1699 = vrcp.f32 %v770_v21 }
 0x404   : > { %v773_v22 = vpop.xlane.xlu1 %772 }
 0x405   : > { %1701 = vrcp.f32 %v773_v22 }
 0x406   : > { %v1696_v15 = vpop.eup %1695 }
 0x408   : > { %v776_v14 = vpop.xlane.xlu0 %775 }
 0x409   : > { %1703 = vrcp.f32 %v776_v14  ;;  %v1430_v14 = vld [vmem:[%s2250_s3] ss:$0 sm:$0xff] }
 0x40a   : > { %v1698_v20 = vpop.eup %1697 }
 0x40e   : > { %v1700_v31 = vpop.eup %1699 }
 0x410   : > { %v782_v50 = vpop.xlane.xlu0 %781 }
 0x411   : > { %1705 = vrcp.f32 %v782_v50 }
 0x412   : > { %v1702_v17 = vpop.eup %1701 }
 0x416   : > { %v1704_v42 = vpop.eup %1703 }
 0x41e   : > { %v1706_v53 = vpop.eup %1705 }
 0x430   : > { %v882_v23 = vpop.f32.mrf.mxu0 }
 0x431   : > { %v1185_v24 = vmul.f32 %v1696_v15, %v882_v23 }
 0x432   : > { %v1542_v25 = vpop.f32.mrf.mxu0 }
 0x433   : > { %1193 = vrot.lane.b32.xlu0 %v1185_v24, %s1877_s26  ;;  %s1791_s26 = scalar_lea.vmem %s2205_s7, 128 }
 0x434   : > { %v885_v26 = vpop.f32.mrf.mxu0  ;;  %v930_v27 = vpop.f32.mrf.mxu1  ;;  %p1792_p11 = scmp.ne.s32.totalorder %s2205_s7, %s1791_s26 }
 0x435   : > { %v1186_v28 = vmul.f32 %v1698_v20, %v930_v27 }
 0x436   : > { %v1543_v29 = vpop.f32.mrf.mxu0  ;;  %v1548_v30 = vpop.f32.mrf.mxu1  ;;  %p1793_p1 = pnand %p1792_p11, %p2267_p0 }
 0x437   : > { %1197 = vrot.lane.b32.xlu1 %v1186_v28, %s1878_s24  ;;  %s1795_s24 = sshll.u32 %s1884_s8, 4  ;;  %s1796_s24 = int_to_ptr.vmem [resolvable:$false] %s1795_s24 }
 0x438   : > { %v933_v32 = vpop.f32.mrf.mxu1  ;;  %v978_v33 = vpop.f32.mrf.mxu0  ;;  %p1794_p2 = pneg %p1793_p1  ;;  %p1798_p6 = scmp.lt.s32.totalorder %s2205_s7, %s1796_s24 }
 0x439   : > { %v1187_v34 = vmul.f32 %v1700_v31, %v978_v33  ;;  %v779_v52 = vpop.xlane.xlu1 %778 }
 0x43a   : > { %v1549_v35 = vpop.f32.mrf.mxu1  ;;  %v1554_v36 = vpop.f32.mrf.mxu0  ;;  %1707 = vrcp.f32 %v779_v52 }
 0x43b   : > { %1201 = vrot.lane.b32.xlu1 %v1187_v34, %s1879_s27  ;;  %s1797_s27 = scalar_lea.vmem %s1796_s24, 256 }
 0x43c   : > { %v981_v37 = vpop.f32.mrf.mxu0  ;;  %v1026_v38 = vpop.f32.mrf.mxu1  ;;  %p1799_p12 = scmp.lt.s32.totalorder %s1797_s27, %s1791_s26 }
 0x43d   : > { %v1188_v39 = vmul.f32 %v1702_v17, %v1026_v38  ;;  %v761_v2 = vpop.xlane.xlu1 %760 }
 0x43e   : > { %v1555_v40 = vpop.f32.mrf.mxu0  ;;  %v1560_v41 = vpop.f32.mrf.mxu1  ;;  %1709 = vrcp.f32 %v761_v2  ;;  %p1800_p7 = por %p1799_p12, %p1798_p6 }
 0x43f   : > { %1205 = vrot.lane.b32.xlu0 %v1188_v39, %s1880_s28 }
 0x440   : > { %v1029_v43 = vpop.f32.mrf.mxu1  ;;  %v1074_v44 = vpop.f32.mrf.mxu0  ;;  %p1801_p9 = pnand %p1800_p7, %p1794_p2 }
 0x441   : > { %v1189_v45 = vmul.f32 %v1704_v42, %v1074_v44 }
 0x442   : > { %v1561_v46 = vpop.f32.mrf.mxu1  ;;  %v1566_v47 = vpop.f32.mrf.mxu0 }
 0x443   : > { %1209 = vrot.lane.b32.xlu1 %v1189_v45, %s1881_s9 }
 0x444   : > { %v1077_v48 = vpop.f32.mrf.mxu0 }
 0x446   : > { %v1567_v49 = vpop.f32.mrf.mxu0 }
 0x447   : > { %v1708_v60 = vpop.eup %1707 }
 0x44b   : > { %v1710_v5 = vpop.eup %1709 }
 0x44c   : > { %v1184_v8 = vmul.f32 %v1710_v5, %v2187_v11 }
 0x465   : > { %v1170_v54 = vpop.f32.mrf.mxu0 }
 0x466   : > { %v1191_v55 = vmul.f32 %v1706_v53, %v1170_v54 }
 0x467   : > { %v1578_v56 = vpop.f32.mrf.mxu0 }
 0x468   : > { %1217 = vrot.lane.b32.xlu1 %v1191_v55, %s1882_s10 }
 0x469   : > { %v1173_v58 = vpop.f32.mrf.mxu0 }
 0x46b   : > { %v1579_v59 = vpop.f32.mrf.mxu0 }
 0x471   : > { %v1122_v61 = vpop.f32.mrf.mxu1 }
 0x472   : > { %v1190_v62 = vmul.f32 %v1708_v60, %v1122_v61 }
 0x473   : > { %v1572_v63 = vpop.f32.mrf.mxu1 }
 0x474   : > { %1213 = vrot.lane.b32.xlu0 %v1190_v62, %s1883_s21 }
 0x475   : > { %v1125_v1 = vpop.f32.mrf.mxu1 }
 0x477   : > { %v1573_v0 = vpop.f32.mrf.mxu1 }
 0x4a5   : > { %v1194_v6 = vpop.permute.xlu0 %1193 }
 0x4a6   : > { %v1220_v9 = vsel %vm327_vm2, %v1184_v8, %v1194_v6 }
 0x4a9   : > { %v1198_v4 = vpop.permute.xlu1 %1197 }
 0x4aa   : > { %v1221_v3 = vsel %vm710_vm4, %v1220_v9, %v1198_v4 }
 0x4ad   : > { %v1202_v7 = vpop.permute.xlu1 %1201 }
 0x4ae   : > { %v1223_v13 = vsel %vm1222_vm5, %v1221_v3, %v1202_v7 }
 0x4b1   : > { %v1206_v10 = vpop.permute.xlu0 %1205 }
 0x4b2   : > { %v1225_v16 = vsel %vm1224_vm6, %v1223_v13, %v1206_v10 }
 0x4b5   : > { %v1210_v12 = vpop.permute.xlu1 %1209 }
 0x4b6   : > { %v1227_v18 = vsel %vm1226_vm7, %v1225_v16, %v1210_v12 }
 0x4da   : > { %v1218_v21 = vpop.permute.xlu1 %1217 }
 0x4e6   : > { %v1214_v19 = vpop.permute.xlu0 %1213 }
 0x4e7   : > { %v1229_v11 = vsel %vm1228_vm8, %v1227_v18, %v1214_v19 }
 0x4e8   : > { %v1231_v22 = vsel %vm1230_vm9, %v1229_v11, %v1218_v21 }
 0x4e9   : > { %v1232_v15 = vpack.c.bf16 %v1231_v22, %v1231_v22 }
 0x4eb   : > { %1585 = vmatmul.mubr.msk.bf16.vlgmr.msra.gmra.mxu1 %vm265_vm1, %v1232_v15 }
 0x5ab   : > { %v1289_v23 = vpop.f32.mrf.mxu1 }
 0x5ac   : > { %v1290_v24 = vadd.f32 %v1430_v14, %v1289_v23 }
 0x5ad   : > { %v1586_v25 = vpop.f32.mrf.mxu1 }
 0x5ae   : > { %1295 = vst.msk [vmem:[%s241_s6] sm:$0xff] %vm265_vm1, %v1290_v24 }
 0x5af   : > { %v1292_v20 = vpop.f32.mrf.mxu1 }
 0x5b0   : > { %1804 = shalt.err (!%p1801_p9)
}
 0x5b1   : > { %s1805_s28 = scalar_lea.hbm %s2203_s25, 128  ;;  %s1809_s10 = scalar_lea.hbm %s2251_s4, 256 }
 0x5b2   : > { %p1806_p13 = scmp.ne.s32.totalorder %s2203_s25, %s1805_s28  ;;  %p1810_p4 = scmp.lt.s32.totalorder %s2203_s25, %s2251_s4 }
 0x5b3   : > { %p1811_p8 = scmp.lt.s32.totalorder %s1809_s10, %s1805_s28 }
 0x5b4   : > { %p1807_p5 = pnand %p1806_p13, %p2267_p0 }
 0x5b5   : > { %p1812_p3 = por %p1811_p8, %p1810_p4 }
 0x5b6   : > { %p1808_p10 = pneg %p1807_p5 }
 0x5b8   : > { %p1813_p11 = pnand %p1812_p3, %p1808_p10 }
 0x5ba   : > { %1816 = shalt.err (!%p1813_p11)
}
 0x5bb   : > { %1598 = dma.vmem_to_hbm [thread:$0]  (%p2267_p0), %s2205_s7, 128, %s2203_s25, %s1297_s19   ;;  %v1587_v26 = vpop.f32.mrf.mxu1 }
 0x5bc PF: > { %s1322_s29 = sand.u32 1, %s1847_s15   ;;  %p2268_p1 = scmp.ne.s32.totalorder %s2257_s22, 0 }
 0x5bd   : > { %p2269_p2 = scmp.ge.s32.totalorder %s1859_s18, 2  ;;  %s1323_s5 = scalar_lea.sflag [#allocation4], %s1322_s29 }
 0x5bf   : > { %p1612_p6 = pnand %p2269_p2, %p2268_p1 }
 0x5c1   : > { %p1613_p12 = pneg %p1612_p6 }
 0x5c3   : > { %1842 = dma.done.wait (%p1613_p12), %s1323_s5, 128  }
 0x5c4   : > { %1844 = vsyncadd (%p1613_p12), %s1323_s5, 4294967168  ;;  %p18_p7 = scmp.ge.s32.totalorder %s1982_s11, 4   ;;  %s2270_s15 = smov %s1851_s16 }
 0x5c5   : > { %s2271_s16 = smov %s1855_s17  ;;  %s2272_s17 = smov %s1998_s20 }
 0x5c6   : > { %s2273_s18 = smov %s1982_s11  ;;  %20 = sbr.rel (!%p18_p7) target bundleno = 6 (0x6), region = 89 }
 0x5cb   :  { %1328 = vsyncpa [#allocation3], 1 }
 0x5cc   :  { %1330 = vsyncpa [#allocation3 + $0x1], 1 }
 0x5cd   :  { %1331 = vsyncpa [#allocation6], 1 }
 0x5ce   :  { %1332 = vsyncpa [#allocation4], 1 }
 0x5cf   :  { %1334 = vsyncpa [#allocation4 + $0x1], 1 }

</bundles_post_ra>
